<compile_context>
chip_gen: v7x
topology: tpu7x:2x2x1
jax: 0.10.0
libtpu: 0.0.40
codegen_flags: <defaults>
</compile_context>

<pallas_src>
import jax
import jax.numpy as jnp
from jax.experimental import pallas as pl
from jax.experimental.pallas import tpu as pltpu


def resnet_flow_kernel(patches_ref, w3_ref, w1_ref, params_ref, o_ref):
    """All-in-VMEM kernel (small shapes).

    patches_ref : (9*Cin, N*H*W) bf16  im2col patches, row = (dy*3+dx)*Cin + c,
                                       column = n*H*W + h*W + w (lane-dense)
    w3_ref      : (Cout, 9*Cin)  bf16  3x3 conv weights, tap-major columns
    w1_ref      : (Cout, Cin)    bf16  1x1 shortcut weights
    params_ref  : (Cout, 4)      f32   columns = [b3, b1, gamma, beta]
    o_ref       : (Cout, N*H*W)  f32   lane-dense output
    """
    nine_cin, nhw = patches_ref.shape
    cin = nine_cin // 9

    patches = patches_ref[...]                                    # (9*Cin, NHW) bf16

    # --- 3x3 conv as one MXU matmul: (Cout, 9*Cin) x (9*Cin, NHW) -> (Cout, NHW) f32
    conv = jax.lax.dot_general(
        w3_ref[...], patches,
        dimension_numbers=(((1,), (0,)), ((), ())),
        preferred_element_type=jnp.float32)

    # --- 1x1 shortcut: reuse the center-tap rows of the patch matrix (no extra data).
    center = patches[4 * cin:5 * cin, :]                          # (Cin, NHW) bf16
    short = jax.lax.dot_general(
        w1_ref[...], center,
        dimension_numbers=(((1,), (0,)), ((), ())),
        preferred_element_type=jnp.float32)                       # (Cout, NHW) f32

    p = params_ref[...]                                           # (Cout, 4) f32
    b3, b1, gamma, beta = p[:, 0:1], p[:, 1:2], p[:, 2:3], p[:, 3:4]

    conv = conv + b3
    short = short + b1

    # --- BatchNorm2d, training-mode semantics (biased variance over N*H*W), two-pass.
    inv_n = 1.0 / float(nhw)
    mean = jnp.sum(conv, axis=-1, keepdims=True) * inv_n          # (Cout, 1)
    centered = conv - mean
    var = jnp.sum(centered * centered, axis=-1, keepdims=True) * inv_n
    scale = jax.lax.rsqrt(var + 1e-5) * gamma                     # (Cout, 1)
    bn = centered * scale + beta

    # --- ReLU + residual add, lane-dense store (last dim 512 -> unmasked vst).
    o_ref[...] = (jnp.maximum(bn, 0.0) + short).astype(o_ref.dtype)


def resnet_flow_forward(x_nchw, w3, b3, w1, b1, gamma, beta):
    """x_nchw: (N, Cin, H, W) f32 (PyTorch layout). Returns (N, Cout, H, W) f32.
    w3: (Cout, Cin, 3, 3), b3: (Cout,), w1: (Cout, Cin, 1, 1), b1: (Cout,),
    gamma/beta: (Cout,)."""
    N, Cin, H, W = x_nchw.shape
    Cout = w3.shape[0]
    nhw = N * H * W

    # --- im2col in the wrapper (fused XLA transpose/pad/slice/concat), bf16 BEFORE
    # windowing so every downstream copy moves half the bytes.
    xp = jnp.pad(jnp.transpose(x_nchw, (1, 0, 2, 3)),
                 ((0, 0), (0, 0), (1, 1), (1, 1))).astype(jnp.bfloat16)  # (Cin,N,H+2,W+2)
    taps = [xp[:, :, dy:dy + H, dx:dx + W]
            for dy in range(3) for dx in range(3)]                 # 9 x (Cin, N, H, W)
    patches = jnp.concatenate(taps, axis=0).reshape(9 * Cin, nhw)  # (9*Cin, NHW) bf16

    # Weights: tap-major 3x3 matrix and plain 1x1 matrix (no zero-padded rows).
    w3m = jnp.transpose(w3, (0, 2, 3, 1)).reshape(Cout, 9 * Cin).astype(jnp.bfloat16)
    w1m = w1[:, :, 0, 0].astype(jnp.bfloat16)                      # (Cout, Cin)

    # Packed per-channel params: one small VMEM tile instead of four.
    params = jnp.stack([b3, b1, gamma, beta], axis=1)              # (Cout, 4) f32

    vmem_spec = pl.BlockSpec(memory_space=pltpu.MemorySpace.VMEM)
    out_flat = pl.pallas_call(
        resnet_flow_kernel,
        out_shape=jax.ShapeDtypeStruct((Cout, nhw), jnp.float32),
        in_specs=[vmem_spec, vmem_spec, vmem_spec, vmem_spec],
        out_specs=vmem_spec,
    )(patches, w3m, w1m, params)

    # (Cout, N*H*W) -> (N, Cout, H, W)
    return jnp.transpose(out_flat.reshape(Cout, N, H, W), (1, 0, 2, 3))


def _reference(x_nchw, w3, b3, w1, b1, gamma, beta):
    """Pure-JAX reference with the PyTorch module's semantics (exact f32 convs)."""
    conv = jax.lax.conv_general_dilated(
        x_nchw, w3, window_strides=(1, 1), padding="SAME",
        dimension_numbers=("NCHW", "OIHW", "NCHW"),
        precision=jax.lax.Precision.HIGHEST) + b3[None, :, None, None]
    mean = jnp.mean(conv, axis=(0, 2, 3), keepdims=True)
    var = jnp.mean((conv - mean) ** 2, axis=(0, 2, 3), keepdims=True)
    bn = (conv - mean) * jax.lax.rsqrt(var + 1e-5)
    bn = bn * gamma[None, :, None, None] + beta[None, :, None, None]
    out = jnp.maximum(bn, 0.0)
    short = jax.lax.conv_general_dilated(
        x_nchw, w1, window_strides=(1, 1), padding="VALID",
        dimension_numbers=("NCHW", "OIHW", "NCHW"),
        precision=jax.lax.Precision.HIGHEST) + b1[None, :, None, None]
    return out + short


def _round_bf16(a):
    return a.astype(jnp.bfloat16).astype(jnp.float32)


if __name__ == "__main__":
    N, Cin, Cout, H, W = 2, 4, 8, 16, 16

    key = jax.random.PRNGKey(0)
    kx, k3, kb3, k1, kb1 = jax.random.split(key, 5)

    x = jax.random.normal(kx, (N, Cin, H, W), dtype=jnp.float32)
    w3 = 0.1 * jax.random.normal(k3, (Cout, Cin, 3, 3), dtype=jnp.float32)
    b3 = 0.1 * jax.random.normal(kb3, (Cout,), dtype=jnp.float32)
    w1 = 0.1 * jax.random.normal(k1, (Cout, Cin, 1, 1), dtype=jnp.float32)
    b1 = 0.1 * jax.random.normal(kb1, (Cout,), dtype=jnp.float32)
    gamma = jnp.ones((Cout,), dtype=jnp.float32)   # BatchNorm2d default init
    beta = jnp.zeros((Cout,), dtype=jnp.float32)

    out = jax.block_until_ready(resnet_flow_forward(x, w3, b3, w1, b1, gamma, beta))
    assert out.shape == (N, Cout, H, W)

    # 1) Precision-matched check: reference with bf16-rounded conv inputs (the exact
    #    values the MXU sees), f32 accumulation -> tight tolerance.
    ref_matched = _reference(_round_bf16(x), _round_bf16(w3), b3,
                             _round_bf16(w1), b1, gamma, beta)
    assert jnp.allclose(out, ref_matched, rtol=5e-3, atol=5e-3)

    # 2) Against the exact f32 module semantics; tolerance reflects bf16 MXU inputs.
    #    (bf16 conv inputs intentionally diverge from PyTorch's f32 conv; swap the
    #    wrapper casts to f32 if bit-level parity with torch is ever required.)
    ref_f32 = _reference(x, w3, b3, w1, b1, gamma, beta)
    assert jnp.allclose(out, ref_f32, rtol=3e-2, atol=3e-2)

    print("KERNEL_OK")
</pallas_src>

<mosaic_0001>
module attributes {stable_mosaic.version = 11 : i64} {
  func.func @resnet_flow_kernel(%arg0: memref<36x512xbf16, #tpu.memory_space<vmem>>, %arg1: memref<8x36xbf16, #tpu.memory_space<vmem>>, %arg2: memref<8x4xbf16, #tpu.memory_space<vmem>>, %arg3: memref<8x4xf32, #tpu.memory_space<vmem>>, %arg4: memref<8x512xf32, #tpu.memory_space<vmem>>) attributes {dimension_semantics = [], scalar_prefetch = 0 : i64, scratch_operands = 0 : i64, tpu.core_type = #tpu.core_type<tc>} {
    %c0 = arith.constant 0 : index
    %c0_0 = arith.constant 0 : index
    %0 = vector.load %arg0[%c0, %c0_0] : memref<36x512xbf16, #tpu.memory_space<vmem>>, vector<36x512xbf16>
    %c0_1 = arith.constant 0 : index
    %c0_2 = arith.constant 0 : index
    %1 = vector.load %arg1[%c0_1, %c0_2] : memref<8x36xbf16, #tpu.memory_space<vmem>>, vector<8x36xbf16>
    %cst = arith.constant dense<0.000000e+00> : vector<8x512xf32>
    %2 = tpu.matmul %1, %0, %cst {dimension_numbers = #tpu.dot_dimension_numbers<[1], [0], [0], [1], [0, 0, 1, 1], [], []>} : vector<8x36xbf16>, vector<36x512xbf16>, vector<8x512xf32> -> vector<8x512xf32>
    %3 = vector.extract_strided_slice %0 {offsets = [16, 0], sizes = [4, 512], strides = [1, 1]} : vector<36x512xbf16> to vector<4x512xbf16>
    %c0_3 = arith.constant 0 : index
    %c0_4 = arith.constant 0 : index
    %4 = vector.load %arg2[%c0_3, %c0_4] : memref<8x4xbf16, #tpu.memory_space<vmem>>, vector<8x4xbf16>
    %cst_5 = arith.constant dense<0.000000e+00> : vector<8x512xf32>
    %5 = tpu.matmul %4, %3, %cst_5 {dimension_numbers = #tpu.dot_dimension_numbers<[1], [0], [0], [1], [0, 0, 1, 1], [], []>} : vector<8x4xbf16>, vector<4x512xbf16>, vector<8x512xf32> -> vector<8x512xf32>
    %c0_6 = arith.constant 0 : index
    %c0_7 = arith.constant 0 : index
    %6 = vector.load %arg3[%c0_6, %c0_7] : memref<8x4xf32, #tpu.memory_space<vmem>>, vector<8x4xf32>
    %7 = vector.extract_strided_slice %6 {offsets = [0, 0], sizes = [8, 1], strides = [1, 1]} : vector<8x4xf32> to vector<8x1xf32>
    %8 = vector.extract_strided_slice %6 {offsets = [0, 1], sizes = [8, 1], strides = [1, 1]} : vector<8x4xf32> to vector<8x1xf32>
    %9 = vector.extract_strided_slice %6 {offsets = [0, 2], sizes = [8, 1], strides = [1, 1]} : vector<8x4xf32> to vector<8x1xf32>
    %10 = vector.extract_strided_slice %6 {offsets = [0, 3], sizes = [8, 1], strides = [1, 1]} : vector<8x4xf32> to vector<8x1xf32>
    %11 = vector.broadcast %7 : vector<8x1xf32> to vector<8x512xf32>
    %12 = arith.addf %2, %11 : vector<8x512xf32>
    %13 = vector.broadcast %8 : vector<8x1xf32> to vector<8x512xf32>
    %14 = arith.addf %5, %13 : vector<8x512xf32>
    %cst_8 = arith.constant dense<0.000000e+00> : vector<8xf32>
    %15 = vector.multi_reduction <add>, %12, %cst_8 [1] : vector<8x512xf32> to vector<8xf32>
    %16 = vector.shape_cast %15 : vector<8xf32> to vector<8x1xf32>
    %cst_9 = arith.constant 0.001953125 : f32
    %17 = vector.broadcast %cst_9 : f32 to vector<8x1xf32>
    %18 = arith.mulf %16, %17 : vector<8x1xf32>
    %19 = vector.broadcast %18 : vector<8x1xf32> to vector<8x512xf32>
    %20 = arith.subf %12, %19 : vector<8x512xf32>
    %21 = arith.mulf %20, %20 : vector<8x512xf32>
    %cst_10 = arith.constant dense<0.000000e+00> : vector<8xf32>
    %22 = vector.multi_reduction <add>, %21, %cst_10 [1] : vector<8x512xf32> to vector<8xf32>
    %23 = vector.shape_cast %22 : vector<8xf32> to vector<8x1xf32>
    %cst_11 = arith.constant 0.001953125 : f32
    %24 = vector.broadcast %cst_11 : f32 to vector<8x1xf32>
    %25 = arith.mulf %23, %24 : vector<8x1xf32>
    %cst_12 = arith.constant 9.99999974E-6 : f32
    %26 = vector.broadcast %cst_12 : f32 to vector<8x1xf32>
    %27 = arith.addf %25, %26 : vector<8x1xf32>
    %28 = math.rsqrt %27 : vector<8x1xf32>
    %29 = arith.mulf %28, %9 : vector<8x1xf32>
    %30 = vector.broadcast %29 : vector<8x1xf32> to vector<8x512xf32>
    %31 = arith.mulf %20, %30 : vector<8x512xf32>
    %32 = vector.broadcast %10 : vector<8x1xf32> to vector<8x512xf32>
    %33 = arith.addf %31, %32 : vector<8x512xf32>
    %cst_13 = arith.constant 0.000000e+00 : f32
    %34 = vector.broadcast %cst_13 : f32 to vector<8x512xf32>
    %35 = arith.maximumf %33, %34 : vector<8x512xf32>
    %36 = arith.addf %35, %14 : vector<8x512xf32>
    %c0_14 = arith.constant 0 : index
    %c0_15 = arith.constant 0 : index
    %37 = vector.load %arg4[%c0_14, %c0_15] : memref<8x512xf32, #tpu.memory_space<vmem>>, vector<8x512xf32>
    tpu.vector_store %arg4[%c0_14, %c0_15], %36 {strides = array<i32>} : memref<8x512xf32, #tpu.memory_space<vmem>>, vector<8x512xf32>,
    return
  }
}

</mosaic_0001>

<bundles_post_ra>
// kernel: tpu_custom_call.1
= control target key start
LH: loop header
LB: loop body
LE: loop exit
PB: predicated region body
PF: predicated region fallthrough
CT: control target
= control target key end

     0   :  { %9 = vsyncpa [#allocation3], 0  ;;  %s558_s0 = inlined_call_operand.hbm [shape: bf16[36,512], index: 0, kind: input, shape index: {}]   ;;  %s559_s1 = inlined_call_operand.vmem [shape: bf16[8,36], index: 1, kind: input, shape index: {}]   ;;  %s560_s2 = inlined_call_operand.vmem [shape: bf16[8,4], index: 2, kind: input, shape index: {}]   ;;  %s561_s3 = inlined_call_operand.vmem [shape: f32[8,4], index: 3, kind: input, shape index: {}]   ;;  %s562_s4 = inlined_call_operand.hbm [shape: f32[8,512], index: 4, kind: output, shape index: {}]  }
   0x1   :  { %10 = vsyncpa [#allocation4], 0  ;;  %s478_s15 = smov [#allocation2]   ;;  %s430_s19 = scalar_lea.hbm %s558_s0, 1280 }
   0x2   :  { %s16_s16 = sshll.u32 %s478_s15, 4  ;;  %p431_p0 = scmp.ne.s32.totalorder %s558_s0, %s430_s19  ;;  %s17_s16 = int_to_ptr.vmem [resolvable:$true] %s16_s16 }
   0x3   :  { %p434_p1 = scmp.lt.u32.totalorder %s430_s19, %s558_s0 }
   0x5   :  { %p436_p2 = pnand %p434_p1, %p431_p0 }
   0x7   :  { %439 = shalt.err (!%p436_p2)
}
   0x8   :  { %s440_s24 = scalar_lea.vmem %s17_s16, 1280  ;;  %p445_p4 = scmp.lt.s32.totalorder %s17_s16, %s17_s16 }
   0x9   :  { %p441_p3 = scmp.ne.s32.totalorder %s17_s16, %s440_s24  ;;  %p446_p5 = scmp.lt.s32.totalorder %s440_s24, %s440_s24 }
   0xb   :  { %p447_p6 = por %p446_p5, %p445_p4 }
   0xd   :  { %p448_p7 = pnand %p447_p6, %p441_p3 }
   0xf   :  { %451 = shalt.err (!%p448_p7)
}
  0x10   :  { %s479_s25 = smov 256   ;;  %s480_s26 = smov 16  }
  0x11   :  { %22 = dma.hbm_to_vmem [thread:$0]  %s558_s0, 1280, %s17_s16, [#allocation3], %s479_s25, %s479_s25, %s480_s26  }
  0x12   :  { %474 = dma.done.wait [#allocation3], 1280  }
  0x13   :  { %475 = vsyncadd [#allocation3], 4294966016  ;;  %v481_v0 = vmov 0   ;;  %v410_v1 = vld [vmem:[#allocation2 + $0x4] ss:$16 sps:$4 sm:$0xff]   ;;  %v38_v7 = vld [vmem:[#allocation2 + $0x28] sm:$0xff] }
  0x14   :  { %150 = vmatprep.mubr.bf16.mxu0 %v481_v0  ;;  %191 = vmatprep.mubr.bf16.mxu1 %v481_v0  ;;  %v412_v2 = vld [vmem:[#allocation2 + $0xc] ss:$16 sps:$4 sm:$0xff]   ;;  %v414_v3 = vld [vmem:[#allocation2] ss:$16 sps:$4 sm:$0xff]   ;;  %v415_v4 = vld [vmem:[#allocation2 + $0x8] ss:$16 sps:$4 sm:$0xff]   ;;  %v392_v40 = vcombine.high %v38_v7, %v38_v7  ;;  %v391_v42 = vcombine.low %v38_v7, %v38_v7 }
  0x15   :  { %405 = vset.pattern.permute.xlu0 %v481_v0  ;;  %118 = vmatprep.subr.bf16.mxu0 %v410_v1  ;;  %v37_v5 = vld [vmem:[#allocation2 + $0x20] sm:$0xff]  ;;  %v39_v6 = vld [vmem:[#allocation2 + $0x30] sm:$0xff]  ;;  %v40_v8 = vld [vmem:[#allocation2 + $0x38] sm:$0xff]  ;;  %vm105_vm0 = vcmask 1041408   ;;  %vm101_vm1 = vcmask 293888   ;;  %vm208_vm2 = vcmask 31744  }
  0x16   :  { %159 = vmatprep.subr.bf16.mxu1 %v412_v2  ;;  %119 = vmatpush1.bf16.msra.mxu0 %v414_v3  ;;  %v378_v9 = vcombine.high %v37_v5, %v39_v6  ;;  %v380_v10 = vcombine.high %v38_v7, %v40_v8  ;;  %v377_v11 = vcombine.low %v37_v5, %v39_v6  ;;  %v41_v12 = vld [vmem:[#allocation2 + $0x40] sm:$0x33]  ;;  %v42_v13 = vld [vmem:[#allocation2 + $0x48] sm:$0x33]  ;;  %v219_v44 = vsel %vm105_vm0, %v391_v42, 0 }
  0x17   :  { %160 = vmatpush1.bf16.msra.mxu1 %v415_v4  ;;  %v379_v14 = vcombine.low %v38_v7, %v40_v8  ;;  %v382_v15 = vcombine.high %v41_v12, %v41_v12  ;;  %v384_v16 = vcombine.high %v42_v13, %v42_v13  ;;  %v381_v17 = vcombine.low %v41_v12, %v41_v12  ;;  %v526_v18 = vld [vmem:[%s561_s3] sm:$0xff] }
  0x18   :  { %120 = vmatprep.subr.bf16.mxu0 %v378_v9  ;;  %161 = vmatprep.subr.bf16.mxu1 %v380_v10  ;;  %v383_v19 = vcombine.low %v42_v13, %v42_v13  ;;  %v43_v22 = vld [vmem:[%s559_s1] sm:$0xf]  ;;  %v390_v39 = vcombine.high %v37_v5, %v37_v5  ;;  %v389_v41 = vcombine.low %v37_v5, %v37_v5  ;;  %v482_v59 = vmov 3  }
  0x19   :  { %48 = vperm.xlu0 %405, %v526_v18   ;;  %v107_v20 = vsel %vm105_vm0, %v381_v17, 0  ;;  %v44_v45 = vld [vmem:[%s560_s2] sm:$0xf]  ;;  %406 = vset.pattern.permute.xlu1 %v482_v59  ;;  %v483_v60 = vmov 2   ;;  %v484_v10 = vmov 1   ;;  %s485_s2 = smov [#allocation5]  }
  0x1a   :  { %121 = vmatpush1.bf16.msra.mxu0 %v377_v11  ;;  %v113_v21 = vsel %vm105_vm0, %v383_v19, 0  ;;  %v213_v43 = vsel %vm105_vm0, %v389_v41, 0  ;;  %s364_s6 = sshll.u32 %s485_s2, 4  ;;  %s365_s6 = int_to_ptr.vmem [resolvable:$true] %s364_s6 }
  0x1b   :  { %162 = vmatpush1.bf16.msra.mxu1 %v379_v14  ;;  %385 = vmatprep.subr.msk.bf16.mxu0 %vm105_vm0, %v382_v15  ;;  %s452_s7 = scalar_lea.vmem %s365_s6, 512  ;;  %p457_p9 = scmp.lt.s32.totalorder %s365_s6, %s365_s6 }
  0x1c   :  { %387 = vmatprep.subr.msk.bf16.mxu1 %vm105_vm0, %v384_v16  ;;  %p453_p8 = scmp.ne.s32.totalorder %s365_s6, %s452_s7  ;;  %p458_p10 = scmp.lt.s32.totalorder %s452_s7, %s452_s7 }
  0x1d   :  { %409 = vset.pattern.permute.xlu0 %v482_v59 }
  0x1e   :  { %123 = vmatpush1.bf16.msra.mxu0 %v107_v20  ;;  %p459_p11 = por %p458_p10, %p457_p9 }
  0x1f   :  { %164 = vmatpush1.bf16.msra.mxu1 %v113_v21  ;;  %393 = vmatprep.subr.msk.bf16.mxu0 %vm105_vm0, %v390_v39 }
  0x20   :  { %395 = vmatprep.subr.msk.bf16.mxu1 %vm105_vm0, %v392_v40  ;;  %p460_p12 = pnand %p459_p11, %p453_p8 }
  0x21   :  { %386 = vmatmul.mubr.msk.bf16.vlgmr.msra.gmra.mrb[0].mxu0 %vm101_vm1, %v43_v22 }
  0x22   :  { %388 = vmatmul.mubr.msk.bf16.vlgmr.msra.gmra.mrb[0].mxu1 %vm101_vm1, %v43_v22  ;;  %256 = vmatprep.mubr.bf16.mxu0 %v481_v0 }
  0x23   :  { %297 = vmatprep.mubr.bf16.mxu1 %v481_v0  ;;  %225 = vmatpush1.bf16.msra.mxu0 %v213_v43 }
  0x24   :  { %266 = vmatpush1.bf16.msra.mxu1 %v219_v44 }
  0x29   :  { %394 = vmatmul.mubr.msk.bf16.vlgmr.msra.gmra.mrb[4].mxu0 %vm208_vm2, %v44_v45 }
  0x2a   :  { %396 = vmatmul.mubr.msk.bf16.vlgmr.msra.gmra.mrb[4].mxu1 %vm208_vm2, %v44_v45 }
  0x98   :  { %v49_v23 = vpop.permute.xlu0 %48 }
  0xf4   :  { %v152_v24 = vpop.f32.mrb[0].mxu0 }
  0xf5   :  { %v193_v25 = vpop.f32.mrb[0].mxu1  ;;  %v153_v26 = vadd.f32 %v152_v24, %v49_v23  ;;  %v154_v27 = vpop.f32.mrb[1].mxu0 }
  0xf6   :  { %v195_v28 = vpop.f32.mrb[1].mxu1  ;;  %v155_v29 = vadd.f32 %v154_v27, %v49_v23  ;;  %v156_v30 = vpop.f32.mrb[2].mxu0  ;;  %v194_v34 = vadd.f32 %v193_v25, %v49_v23 }
  0xf7   :  { %v197_v31 = vpop.f32.mrb[2].mxu1  ;;  %v157_v32 = vpop.f32.mrb[3].mxu0  ;;  %v196_v36 = vadd.f32 %v195_v28, %v49_v23 }
  0xf8   :  { %v198_v33 = vpop.f32.mrb[3].mxu1  ;;  %v306_v35 = vadd.f32 %v155_v29, %v153_v26 }
  0xfa   :  { %v307_v37 = vadd.f32 %v306_v35, %v194_v34 }
  0xfc   :  { %v308_v38 = vadd.f32 %v307_v37, %v196_v36  ;;  %v258_v2 = vpop.f32.mrb[4].mxu0 }
  0xfd   :  { %v299_v3 = vpop.f32.mrb[4].mxu1  ;;  %v260_v4 = vpop.f32.mrb[5].mxu0 }
  0xfe   :  { %309 = vadd.xlane.f32.xlu0 %v308_v38  ;;  %v301_v5 = vpop.f32.mrb[5].mxu1  ;;  %v262_v6 = vpop.f32.mrb[6].mxu0 }
  0xff   :  { %v303_v7 = vpop.f32.mrb[6].mxu1  ;;  %v263_v8 = vpop.f32.mrb[7].mxu0 }
 0x100   :  { %v304_v9 = vpop.f32.mrb[7].mxu1 }
 0x18b   :  { %v310_v46 = vpop.xlane.xlu0 %309 }
 0x18c   :  { %v311_v47 = vmul.f32 0.001953125, %v310_v46 }
 0x18e   :  { %v312_v48 = vsub.f32 %v153_v26, %v311_v47  ;;  %v313_v49 = vsub.f32 %v155_v29, %v311_v47  ;;  %v314_v50 = vsub.f32 %v194_v34, %v311_v47  ;;  %v315_v51 = vsub.f32 %v196_v36, %v311_v47 }
 0x190   :  { %v316_v52 = vmul.f32 %v312_v48, %v312_v48  ;;  %v317_v53 = vmul.f32 %v313_v49, %v313_v49  ;;  %v318_v54 = vmul.f32 %v314_v50, %v314_v50  ;;  %v319_v56 = vmul.f32 %v315_v51, %v315_v51 }
 0x192   :  { %v320_v55 = vadd.f32 %v317_v53, %v316_v52 }
 0x194   :  { %v321_v57 = vadd.f32 %v320_v55, %v318_v54 }
 0x196   :  { %v322_v58 = vadd.f32 %v321_v57, %v319_v56 }
 0x198   :  { %323 = vadd.xlane.f32.xlu1 %v322_v58 }
 0x1a9   :  { %339 = vperm.xlu1 %406, %v526_v18  }
 0x1ad   :  { %407 = vset.pattern.permute.xlu1 %v483_v60 }
 0x225   :  { %v324_v61 = vpop.xlane.xlu1 %323 }
 0x226   :  { %v325_v62 = vmul.f32 0.001953125, %v324_v61 }
 0x228   :  { %v326_v63 = vadd.f32 1e-05, %v325_v62 }
 0x229   :  { %v340_v11 = vpop.permute.xlu1 %339 }
 0x22a   :  { %428 = vrsqrt.f32 %v326_v63 }
 0x234   :  { %v429_v0 = vpop.eup %428 }
 0x235   :  { %v328_v1 = vmul.f32 %v429_v0, %v526_v18 }
 0x237   :  { %331 = vperm.xlu1 %407, %v328_v1  }
 0x23b   :  { %408 = vset.pattern.permute.xlu1 %v484_v10 }
 0x23c   :  { %201 = vperm.xlu1 %408, %v526_v18  }
 0x2b6   :  { %v332_v12 = vpop.permute.xlu1 %331 }
 0x2b7   :  { %v334_v13 = vmul.f32 %v332_v12, %v312_v48  ;;  %v335_v14 = vmul.f32 %v332_v12, %v313_v49  ;;  %v336_v15 = vmul.f32 %v332_v12, %v314_v50  ;;  %v337_v16 = vmul.f32 %v332_v12, %v315_v51 }
 0x2b9   :  { %v342_v17 = vadd.f32 %v340_v11, %v334_v13  ;;  %v343_v19 = vadd.f32 %v340_v11, %v335_v14  ;;  %v344_v20 = vadd.f32 %v340_v11, %v336_v15  ;;  %v345_v21 = vadd.f32 %v340_v11, %v337_v16 }
 0x2bb   :  { %v346_v22 = vmax.f32 %v342_v17, 0.0  ;;  %v347_v23 = vmax.f32 %v343_v19, 0.0  ;;  %v348_v24 = vmax.f32 %v344_v20, 0.0  ;;  %v349_v25 = vmax.f32 %v345_v21, 0.0  ;;  %v202_v26 = vpop.permute.xlu1 %201 }
 0x2bc   :  { %v259_v27 = vadd.f32 %v258_v2, %v202_v26  ;;  %v261_v28 = vadd.f32 %v260_v4, %v202_v26  ;;  %v300_v18 = vadd.f32 %v299_v3, %v202_v26  ;;  %v302_v29 = vadd.f32 %v301_v5, %v202_v26 }
 0x2be   :  { %v350_v30 = vadd.f32 %v346_v22, %v259_v27  ;;  %v351_v31 = vadd.f32 %v347_v23, %v261_v28  ;;  %v352_v32 = vadd.f32 %v348_v24, %v300_v18  ;;  %v353_v33 = vadd.f32 %v349_v25, %v302_v29 }
 0x2c0   :  { %354 = vst [vmem:[#allocation5] sm:$0xff] %v350_v30  ;;  %355 = vst [vmem:[#allocation5 + $0x8] sm:$0xff] %v351_v31 }
 0x2c1   :  { %356 = vst [vmem:[#allocation5 + $0x10] sm:$0xff] %v352_v32  ;;  %357 = vst [vmem:[#allocation5 + $0x18] sm:$0xff] %v353_v33 }
 0x2c2   :  { %463 = shalt.err (!%p460_p12)
}
 0x2c3   :  { %s464_s10 = scalar_lea.hbm %s562_s4, 512 }
 0x2c4   :  { %p465_p13 = scmp.ne.s32.totalorder %s562_s4, %s464_s10  ;;  %p468_p0 = scmp.lt.u32.totalorder %s464_s10, %s562_s4 }
 0x2c6   :  { %p470_p1 = pnand %p468_p0, %p465_p13 }
 0x2c8   :  { %473 = shalt.err (!%p470_p1)
}
 0x2c9   :  { %367 = dma.vmem_to_hbm [thread:$0]  %s365_s6, 512, %s562_s4, [#allocation4]  }
 0x2ca   :  { %476 = dma.done.wait [#allocation4], 512  }
 0x2cb   :  { %477 = vsyncadd [#allocation4], 4294966784 }
 0x2cc   :  { %371 = vsyncpa [#allocation3], 1 }
 0x2cd   :  { %372 = vsyncpa [#allocation4], 1 }

</bundles_post_ra>
